<compile_context>
chip_gen: v7x
topology: tpu7x:2x2x1
jax: 0.10.0
libtpu: 0.0.40
codegen_flags: <defaults>
</compile_context>

<pallas_src>
import jax
import jax.numpy as jnp
from jax.experimental import pallas as pl
from jax.experimental.pallas import tpu as pltpu

EPS = 1e-5
NUM_LAYERS = 5


# ----------------------------------------------------------------------------
# Fused kernel
# ----------------------------------------------------------------------------
def _fused_kernel(*refs):
    # refs = [x, (wstack, bias, s0, s1, s2) * 5, out]
    x_ref = refs[0]
    o_ref = refs[-1]
    layer_refs = refs[1:-1]

    h = x_ref[...].astype(jnp.float32)                     # (Cin0, B*L0)
    for i in range(NUM_LAYERS):
        w_ref, b_ref, s0_ref, s1_ref, s2_ref = layer_refs[5 * i:5 * i + 5]
        cout = w_ref.shape[0] // 3
        # Single channel-mixing matmul for all three conv taps.
        z = jnp.dot(w_ref[...], h, preferred_element_type=jnp.float32)
        # Tap select + stride-2 downsample (+ avg-pool on the last layer) as
        # matmuls against 0/1 (or 1/Lo) selection matrices.  Row slices of z
        # are sublane-aligned (Cout is 8 or 16).
        y = (jnp.dot(z[0 * cout:1 * cout], s0_ref[...],
                     preferred_element_type=jnp.float32)
             + jnp.dot(z[1 * cout:2 * cout], s1_ref[...],
                       preferred_element_type=jnp.float32)
             + jnp.dot(z[2 * cout:3 * cout], s2_ref[...],
                       preferred_element_type=jnp.float32))
        y = y + b_ref[...]                                 # folded BN / conv bias
        if i < NUM_LAYERS - 1:
            y = jnp.maximum(y, 0.0)                        # ReLU
        h = y
    o_ref[...] = h.astype(o_ref.dtype)                     # (Cout_last, B)


# ----------------------------------------------------------------------------
# Trace-time preparation (weight folding + selection matrices)
# ----------------------------------------------------------------------------
def _selection_matrices(batch, length):
    """S_k[b*L + j, b*Lo + t] = 1  iff  j == 2*t + k - 1   (k = 0, 1, 2).

    Implements Conv1d(kernel=3, stride=2, padding=1) tap gathering; the
    out-of-range index -1 (k=0, t=0) simply has no matching row -> zero pad.
    """
    lo = length // 2
    j = jnp.arange(length)[:, None]
    t = jnp.arange(lo)[None, :]
    eye_b = jnp.eye(batch, dtype=jnp.float32)
    mats = []
    for k in range(3):
        sk = (j == 2 * t + k - 1).astype(jnp.float32)      # (L, Lo)
        mats.append(jnp.kron(eye_b, sk))                   # (B*L, B*Lo)
    return mats


def _prepare_inputs(x, params):
    b_sz, cin0, length = x.shape
    assert length % (2 ** NUM_LAYERS) == 0, "seq length must be divisible by 32"
    # Activation layout: channels on sublanes, (batch, length) on lanes.
    h0 = jnp.transpose(x, (1, 0, 2)).reshape(cin0, b_sz * length)

    flat = []
    l = length
    for i, p in enumerate(params):
        if i < NUM_LAYERS - 1:
            w, scale, bias = p                 # eval-mode BN scale/bias
            w = w * scale[None, :, :]          # fold BN scale into conv weights
        else:
            w, bias = p                        # final conv has a real bias
        cout, cin = w.shape[1], w.shape[2]
        wstack = w.reshape(3 * cout, cin)      # [W0; W1; W2] stacked (scaled)
        lo = l // 2
        s0, s1, s2 = _selection_matrices(b_sz, l)
        if i == NUM_LAYERS - 1:
            # Fold the global average pool into the last layer's selection.
            pool = jnp.kron(jnp.eye(b_sz, dtype=jnp.float32),
                            jnp.full((lo, 1), 1.0 / lo, jnp.float32))
            s0, s1, s2 = s0 @ pool, s1 @ pool, s2 @ pool    # (B*L, B)
        flat += [wstack.astype(jnp.float32), bias.astype(jnp.float32),
                 s0, s1, s2]
        l = lo
    return h0.astype(jnp.float32), flat


def voice_embed_net(x, params):
    b_sz = x.shape[0]
    cout_last = params[-1][0].shape[1]
    h0, flat = _prepare_inputs(x, params)
    vmem = pl.BlockSpec(memory_space=pltpu.MemorySpace.VMEM)
    out = pl.pallas_call(
        _fused_kernel,
        out_shape=jax.ShapeDtypeStruct((cout_last, b_sz), x.dtype),
        in_specs=[vmem] * (1 + len(flat)),
        out_specs=vmem,
    )(h0, *flat)
    # (Cout, B) -> (B, Cout, 1, 1), matching the PyTorch module.
    return out.T.reshape(b_sz, cout_last, 1, 1)


# ----------------------------------------------------------------------------
# Parameter init (deterministic, synthetic; eval-mode BatchNorm folded)
# ----------------------------------------------------------------------------
def init_params(key, input_channel, channels, output_channel):
    dims = [input_channel] + list(channels) + [output_channel]
    params = []
    for i in range(NUM_LAYERS):
        cin, cout = dims[i], dims[i + 1]
        key, kw, kg, kb, km, kv, kc = jax.random.split(key, 7)
        w = (0.1 * jax.random.normal(kw, (3, cout, cin))).astype(jnp.float32)
        if i < NUM_LAYERS - 1:
            gamma = 1.0 + 0.1 * jax.random.normal(kg, (cout,))
            beta = 0.1 * jax.random.normal(kb, (cout,))
            r_mean = 0.1 * jax.random.normal(km, (cout,))
            r_var = 1.0 + 0.1 * jax.random.uniform(kv, (cout,))
            scale = gamma / jnp.sqrt(r_var + EPS)
            bias = beta - r_mean * scale
            params.append((w,
                           scale.reshape(cout, 1).astype(jnp.float32),
                           bias.reshape(cout, 1).astype(jnp.float32)))
        else:
            b = (0.1 * jax.random.normal(kc, (cout,))).astype(jnp.float32)
            params.append((w, b.reshape(cout, 1)))
    return params


# ----------------------------------------------------------------------------
# Pure-JAX reference for correctness check
# ----------------------------------------------------------------------------
def reference(x, params):
    def conv(xx, w):
        wt = jnp.transpose(w, (1, 2, 0))  # (Cout, Cin, 3)
        return jax.lax.conv_general_dilated(
            xx, wt, window_strides=(2,), padding=((1, 1),),
            dimension_numbers=("NCH", "OIH", "NCH"))
    for (w, scale, bias) in params[:NUM_LAYERS - 1]:
        x = conv(x, w)
        x = x * scale[None] + bias[None]
        x = jnp.maximum(x, 0.0)
    w, b = params[NUM_LAYERS - 1]
    x = conv(x, w) + b[None]
    x = jnp.mean(x, axis=2)
    return x.reshape(x.shape[0], -1, 1, 1)


# ----------------------------------------------------------------------------
if __name__ == "__main__":
    key = jax.random.PRNGKey(0)
    kx, kp = jax.random.split(key)

    batch = 2
    input_channel = 4
    channels = [8, 8, 16, 16]
    output_channel = 8
    seq_len = 64  # 64 -> 32 -> 16 -> 8 -> 4 -> 2 -> avg-pool -> 1

    x = jax.random.normal(kx, (batch, input_channel, seq_len), jnp.float32)
    params = init_params(kp, input_channel, channels, output_channel)

    out = voice_embed_net(x, params)
    out = jax.block_until_ready(out)

    ref = reference(x, params)
    assert out.shape == (batch, output_channel, 1, 1)
    assert jnp.allclose(out, ref, atol=1e-4, rtol=1e-4)

    print("KERNEL_OK")
</pallas_src>

<mosaic_0001>
module attributes {stable_mosaic.version = 11 : i64} {
  func.func @_fused_kernel(%arg0: memref<4x128xf32, #tpu.memory_space<vmem>>, %arg1: memref<24x4xf32, #tpu.memory_space<vmem>>, %arg2: memref<8x1xf32, #tpu.memory_space<vmem>>, %arg3: memref<128x64xf32, #tpu.memory_space<vmem>>, %arg4: memref<128x64xf32, #tpu.memory_space<vmem>>, %arg5: memref<128x64xf32, #tpu.memory_space<vmem>>, %arg6: memref<24x8xf32, #tpu.memory_space<vmem>>, %arg7: memref<8x1xf32, #tpu.memory_space<vmem>>, %arg8: memref<64x32xf32, #tpu.memory_space<vmem>>, %arg9: memref<64x32xf32, #tpu.memory_space<vmem>>, %arg10: memref<64x32xf32, #tpu.memory_space<vmem>>, %arg11: memref<48x8xf32, #tpu.memory_space<vmem>>, %arg12: memref<16x1xf32, #tpu.memory_space<vmem>>, %arg13: memref<32x16xf32, #tpu.memory_space<vmem>>, %arg14: memref<32x16xf32, #tpu.memory_space<vmem>>, %arg15: memref<32x16xf32, #tpu.memory_space<vmem>>, %arg16: memref<48x16xf32, #tpu.memory_space<vmem>>, %arg17: memref<16x1xf32, #tpu.memory_space<vmem>>, %arg18: memref<16x8xf32, #tpu.memory_space<vmem>>, %arg19: memref<16x8xf32, #tpu.memory_space<vmem>>, %arg20: memref<16x8xf32, #tpu.memory_space<vmem>>, %arg21: memref<24x16xf32, #tpu.memory_space<vmem>>, %arg22: memref<8x1xf32, #tpu.memory_space<vmem>>, %arg23: memref<8x2xf32, #tpu.memory_space<vmem>>, %arg24: memref<8x2xf32, #tpu.memory_space<vmem>>, %arg25: memref<8x2xf32, #tpu.memory_space<vmem>>, %arg26: memref<8x2xf32, #tpu.memory_space<vmem>>) attributes {dimension_semantics = [], scalar_prefetch = 0 : i64, scratch_operands = 0 : i64, tpu.core_type = #tpu.core_type<tc>} {
    %c0 = arith.constant 0 : index
    %c0_0 = arith.constant 0 : index
    %0 = vector.load %arg0[%c0, %c0_0] : memref<4x128xf32, #tpu.memory_space<vmem>>, vector<4x128xf32>
    %c0_1 = arith.constant 0 : index
    %c0_2 = arith.constant 0 : index
    %1 = vector.load %arg1[%c0_1, %c0_2] : memref<24x4xf32, #tpu.memory_space<vmem>>, vector<24x4xf32>
    %cst = arith.constant dense<0.000000e+00> : vector<24x128xf32>
    %2 = tpu.matmul %1, %0, %cst {dimension_numbers = #tpu.dot_dimension_numbers<[1], [0], [0], [1], [0, 0, 1, 1], [], []>} : vector<24x4xf32>, vector<4x128xf32>, vector<24x128xf32> -> vector<24x128xf32>
    %3 = vector.extract_strided_slice %2 {offsets = [0, 0], sizes = [8, 128], strides = [1, 1]} : vector<24x128xf32> to vector<8x128xf32>
    %c0_3 = arith.constant 0 : index
    %c0_4 = arith.constant 0 : index
    %4 = vector.load %arg3[%c0_3, %c0_4] : memref<128x64xf32, #tpu.memory_space<vmem>>, vector<128x64xf32>
    %cst_5 = arith.constant dense<0.000000e+00> : vector<8x64xf32>
    %5 = tpu.matmul %3, %4, %cst_5 {dimension_numbers = #tpu.dot_dimension_numbers<[1], [0], [0], [1], [0, 0, 1, 1], [], []>} : vector<8x128xf32>, vector<128x64xf32>, vector<8x64xf32> -> vector<8x64xf32>
    %6 = vector.extract_strided_slice %2 {offsets = [8, 0], sizes = [8, 128], strides = [1, 1]} : vector<24x128xf32> to vector<8x128xf32>
    %c0_6 = arith.constant 0 : index
    %c0_7 = arith.constant 0 : index
    %7 = vector.load %arg4[%c0_6, %c0_7] : memref<128x64xf32, #tpu.memory_space<vmem>>, vector<128x64xf32>
    %cst_8 = arith.constant dense<0.000000e+00> : vector<8x64xf32>
    %8 = tpu.matmul %6, %7, %cst_8 {dimension_numbers = #tpu.dot_dimension_numbers<[1], [0], [0], [1], [0, 0, 1, 1], [], []>} : vector<8x128xf32>, vector<128x64xf32>, vector<8x64xf32> -> vector<8x64xf32>
    %9 = arith.addf %5, %8 : vector<8x64xf32>
    %10 = vector.extract_strided_slice %2 {offsets = [16, 0], sizes = [8, 128], strides = [1, 1]} : vector<24x128xf32> to vector<8x128xf32>
    %c0_9 = arith.constant 0 : index
    %c0_10 = arith.constant 0 : index
    %11 = vector.load %arg5[%c0_9, %c0_10] : memref<128x64xf32, #tpu.memory_space<vmem>>, vector<128x64xf32>
    %cst_11 = arith.constant dense<0.000000e+00> : vector<8x64xf32>
    %12 = tpu.matmul %10, %11, %cst_11 {dimension_numbers = #tpu.dot_dimension_numbers<[1], [0], [0], [1], [0, 0, 1, 1], [], []>} : vector<8x128xf32>, vector<128x64xf32>, vector<8x64xf32> -> vector<8x64xf32>
    %13 = arith.addf %9, %12 : vector<8x64xf32>
    %c0_12 = arith.constant 0 : index
    %c0_13 = arith.constant 0 : index
    %14 = vector.load %arg2[%c0_12, %c0_13] : memref<8x1xf32, #tpu.memory_space<vmem>>, vector<8x1xf32>
    %15 = vector.broadcast %14 : vector<8x1xf32> to vector<8x64xf32>
    %16 = arith.addf %13, %15 : vector<8x64xf32>
    %cst_14 = arith.constant 0.000000e+00 : f32
    %17 = vector.broadcast %cst_14 : f32 to vector<8x64xf32>
    %18 = arith.maximumf %16, %17 : vector<8x64xf32>
    %c0_15 = arith.constant 0 : index
    %c0_16 = arith.constant 0 : index
    %19 = vector.load %arg6[%c0_15, %c0_16] : memref<24x8xf32, #tpu.memory_space<vmem>>, vector<24x8xf32>
    %cst_17 = arith.constant dense<0.000000e+00> : vector<24x64xf32>
    %20 = tpu.matmul %19, %18, %cst_17 {dimension_numbers = #tpu.dot_dimension_numbers<[1], [0], [0], [1], [0, 0, 1, 1], [], []>} : vector<24x8xf32>, vector<8x64xf32>, vector<24x64xf32> -> vector<24x64xf32>
    %21 = vector.extract_strided_slice %20 {offsets = [0, 0], sizes = [8, 64], strides = [1, 1]} : vector<24x64xf32> to vector<8x64xf32>
    %c0_18 = arith.constant 0 : index
    %c0_19 = arith.constant 0 : index
    %22 = vector.load %arg8[%c0_18, %c0_19] : memref<64x32xf32, #tpu.memory_space<vmem>>, vector<64x32xf32>
    %cst_20 = arith.constant dense<0.000000e+00> : vector<8x32xf32>
    %23 = tpu.matmul %21, %22, %cst_20 {dimension_numbers = #tpu.dot_dimension_numbers<[1], [0], [0], [1], [0, 0, 1, 1], [], []>} : vector<8x64xf32>, vector<64x32xf32>, vector<8x32xf32> -> vector<8x32xf32>
    %24 = vector.extract_strided_slice %20 {offsets = [8, 0], sizes = [8, 64], strides = [1, 1]} : vector<24x64xf32> to vector<8x64xf32>
    %c0_21 = arith.constant 0 : index
    %c0_22 = arith.constant 0 : index
    %25 = vector.load %arg9[%c0_21, %c0_22] : memref<64x32xf32, #tpu.memory_space<vmem>>, vector<64x32xf32>
    %cst_23 = arith.constant dense<0.000000e+00> : vector<8x32xf32>
    %26 = tpu.matmul %24, %25, %cst_23 {dimension_numbers = #tpu.dot_dimension_numbers<[1], [0], [0], [1], [0, 0, 1, 1], [], []>} : vector<8x64xf32>, vector<64x32xf32>, vector<8x32xf32> -> vector<8x32xf32>
    %27 = arith.addf %23, %26 : vector<8x32xf32>
    %28 = vector.extract_strided_slice %20 {offsets = [16, 0], sizes = [8, 64], strides = [1, 1]} : vector<24x64xf32> to vector<8x64xf32>
    %c0_24 = arith.constant 0 : index
    %c0_25 = arith.constant 0 : index
    %29 = vector.load %arg10[%c0_24, %c0_25] : memref<64x32xf32, #tpu.memory_space<vmem>>, vector<64x32xf32>
    %cst_26 = arith.constant dense<0.000000e+00> : vector<8x32xf32>
    %30 = tpu.matmul %28, %29, %cst_26 {dimension_numbers = #tpu.dot_dimension_numbers<[1], [0], [0], [1], [0, 0, 1, 1], [], []>} : vector<8x64xf32>, vector<64x32xf32>, vector<8x32xf32> -> vector<8x32xf32>
    %31 = arith.addf %27, %30 : vector<8x32xf32>
    %c0_27 = arith.constant 0 : index
    %c0_28 = arith.constant 0 : index
    %32 = vector.load %arg7[%c0_27, %c0_28] : memref<8x1xf32, #tpu.memory_space<vmem>>, vector<8x1xf32>
    %33 = vector.broadcast %32 : vector<8x1xf32> to vector<8x32xf32>
    %34 = arith.addf %31, %33 : vector<8x32xf32>
    %cst_29 = arith.constant 0.000000e+00 : f32
    %35 = vector.broadcast %cst_29 : f32 to vector<8x32xf32>
    %36 = arith.maximumf %34, %35 : vector<8x32xf32>
    %c0_30 = arith.constant 0 : index
    %c0_31 = arith.constant 0 : index
    %37 = vector.load %arg11[%c0_30, %c0_31] : memref<48x8xf32, #tpu.memory_space<vmem>>, vector<48x8xf32>
    %cst_32 = arith.constant dense<0.000000e+00> : vector<48x32xf32>
    %38 = tpu.matmul %37, %36, %cst_32 {dimension_numbers = #tpu.dot_dimension_numbers<[1], [0], [0], [1], [0, 0, 1, 1], [], []>} : vector<48x8xf32>, vector<8x32xf32>, vector<48x32xf32> -> vector<48x32xf32>
    %39 = vector.extract_strided_slice %38 {offsets = [0, 0], sizes = [16, 32], strides = [1, 1]} : vector<48x32xf32> to vector<16x32xf32>
    %c0_33 = arith.constant 0 : index
    %c0_34 = arith.constant 0 : index
    %40 = vector.load %arg13[%c0_33, %c0_34] : memref<32x16xf32, #tpu.memory_space<vmem>>, vector<32x16xf32>
    %cst_35 = arith.constant dense<0.000000e+00> : vector<16x16xf32>
    %41 = tpu.matmul %39, %40, %cst_35 {dimension_numbers = #tpu.dot_dimension_numbers<[1], [0], [0], [1], [0, 0, 1, 1], [], []>} : vector<16x32xf32>, vector<32x16xf32>, vector<16x16xf32> -> vector<16x16xf32>
    %42 = vector.extract_strided_slice %38 {offsets = [16, 0], sizes = [16, 32], strides = [1, 1]} : vector<48x32xf32> to vector<16x32xf32>
    %c0_36 = arith.constant 0 : index
    %c0_37 = arith.constant 0 : index
    %43 = vector.load %arg14[%c0_36, %c0_37] : memref<32x16xf32, #tpu.memory_space<vmem>>, vector<32x16xf32>
    %cst_38 = arith.constant dense<0.000000e+00> : vector<16x16xf32>
    %44 = tpu.matmul %42, %43, %cst_38 {dimension_numbers = #tpu.dot_dimension_numbers<[1], [0], [0], [1], [0, 0, 1, 1], [], []>} : vector<16x32xf32>, vector<32x16xf32>, vector<16x16xf32> -> vector<16x16xf32>
    %45 = arith.addf %41, %44 : vector<16x16xf32>
    %46 = vector.extract_strided_slice %38 {offsets = [32, 0], sizes = [16, 32], strides = [1, 1]} : vector<48x32xf32> to vector<16x32xf32>
    %c0_39 = arith.constant 0 : index
    %c0_40 = arith.constant 0 : index
    %47 = vector.load %arg15[%c0_39, %c0_40] : memref<32x16xf32, #tpu.memory_space<vmem>>, vector<32x16xf32>
    %cst_41 = arith.constant dense<0.000000e+00> : vector<16x16xf32>
    %48 = tpu.matmul %46, %47, %cst_41 {dimension_numbers = #tpu.dot_dimension_numbers<[1], [0], [0], [1], [0, 0, 1, 1], [], []>} : vector<16x32xf32>, vector<32x16xf32>, vector<16x16xf32> -> vector<16x16xf32>
    %49 = arith.addf %45, %48 : vector<16x16xf32>
    %c0_42 = arith.constant 0 : index
    %c0_43 = arith.constant 0 : index
    %50 = vector.load %arg12[%c0_42, %c0_43] : memref<16x1xf32, #tpu.memory_space<vmem>>, vector<16x1xf32>
    %51 = vector.broadcast %50 : vector<16x1xf32> to vector<16x16xf32>
    %52 = arith.addf %49, %51 : vector<16x16xf32>
    %cst_44 = arith.constant 0.000000e+00 : f32
    %53 = vector.broadcast %cst_44 : f32 to vector<16x16xf32>
    %54 = arith.maximumf %52, %53 : vector<16x16xf32>
    %c0_45 = arith.constant 0 : index
    %c0_46 = arith.constant 0 : index
    %55 = vector.load %arg16[%c0_45, %c0_46] : memref<48x16xf32, #tpu.memory_space<vmem>>, vector<48x16xf32>
    %cst_47 = arith.constant dense<0.000000e+00> : vector<48x16xf32>
    %56 = tpu.matmul %55, %54, %cst_47 {dimension_numbers = #tpu.dot_dimension_numbers<[1], [0], [0], [1], [0, 0, 1, 1], [], []>} : vector<48x16xf32>, vector<16x16xf32>, vector<48x16xf32> -> vector<48x16xf32>
    %57 = vector.extract_strided_slice %56 {offsets = [0, 0], sizes = [16, 16], strides = [1, 1]} : vector<48x16xf32> to vector<16x16xf32>
    %c0_48 = arith.constant 0 : index
    %c0_49 = arith.constant 0 : index
    %58 = vector.load %arg18[%c0_48, %c0_49] : memref<16x8xf32, #tpu.memory_space<vmem>>, vector<16x8xf32>
    %cst_50 = arith.constant dense<0.000000e+00> : vector<16x8xf32>
    %59 = tpu.matmul %57, %58, %cst_50 {dimension_numbers = #tpu.dot_dimension_numbers<[1], [0], [0], [1], [0, 0, 1, 1], [], []>} : vector<16x16xf32>, vector<16x8xf32>, vector<16x8xf32> -> vector<16x8xf32>
    %60 = vector.extract_strided_slice %56 {offsets = [16, 0], sizes = [16, 16], strides = [1, 1]} : vector<48x16xf32> to vector<16x16xf32>
    %c0_51 = arith.constant 0 : index
    %c0_52 = arith.constant 0 : index
    %61 = vector.load %arg19[%c0_51, %c0_52] : memref<16x8xf32, #tpu.memory_space<vmem>>, vector<16x8xf32>
    %cst_53 = arith.constant dense<0.000000e+00> : vector<16x8xf32>
    %62 = tpu.matmul %60, %61, %cst_53 {dimension_numbers = #tpu.dot_dimension_numbers<[1], [0], [0], [1], [0, 0, 1, 1], [], []>} : vector<16x16xf32>, vector<16x8xf32>, vector<16x8xf32> -> vector<16x8xf32>
    %63 = arith.addf %59, %62 : vector<16x8xf32>
    %64 = vector.extract_strided_slice %56 {offsets = [32, 0], sizes = [16, 16], strides = [1, 1]} : vector<48x16xf32> to vector<16x16xf32>
    %c0_54 = arith.constant 0 : index
    %c0_55 = arith.constant 0 : index
    %65 = vector.load %arg20[%c0_54, %c0_55] : memref<16x8xf32, #tpu.memory_space<vmem>>, vector<16x8xf32>
    %cst_56 = arith.constant dense<0.000000e+00> : vector<16x8xf32>
    %66 = tpu.matmul %64, %65, %cst_56 {dimension_numbers = #tpu.dot_dimension_numbers<[1], [0], [0], [1], [0, 0, 1, 1], [], []>} : vector<16x16xf32>, vector<16x8xf32>, vector<16x8xf32> -> vector<16x8xf32>
    %67 = arith.addf %63, %66 : vector<16x8xf32>
    %c0_57 = arith.constant 0 : index
    %c0_58 = arith.constant 0 : index
    %68 = vector.load %arg17[%c0_57, %c0_58] : memref<16x1xf32, #tpu.memory_space<vmem>>, vector<16x1xf32>
    %69 = vector.broadcast %68 : vector<16x1xf32> to vector<16x8xf32>
    %70 = arith.addf %67, %69 : vector<16x8xf32>
    %cst_59 = arith.constant 0.000000e+00 : f32
    %71 = vector.broadcast %cst_59 : f32 to vector<16x8xf32>
    %72 = arith.maximumf %70, %71 : vector<16x8xf32>
    %c0_60 = arith.constant 0 : index
    %c0_61 = arith.constant 0 : index
    %73 = vector.load %arg21[%c0_60, %c0_61] : memref<24x16xf32, #tpu.memory_space<vmem>>, vector<24x16xf32>
    %cst_62 = arith.constant dense<0.000000e+00> : vector<24x8xf32>
    %74 = tpu.matmul %73, %72, %cst_62 {dimension_numbers = #tpu.dot_dimension_numbers<[1], [0], [0], [1], [0, 0, 1, 1], [], []>} : vector<24x16xf32>, vector<16x8xf32>, vector<24x8xf32> -> vector<24x8xf32>
    %75 = vector.extract_strided_slice %74 {offsets = [0, 0], sizes = [8, 8], strides = [1, 1]} : vector<24x8xf32> to vector<8x8xf32>
    %c0_63 = arith.constant 0 : index
    %c0_64 = arith.constant 0 : index
    %76 = vector.load %arg23[%c0_63, %c0_64] : memref<8x2xf32, #tpu.memory_space<vmem>>, vector<8x2xf32>
    %cst_65 = arith.constant dense<0.000000e+00> : vector<8x2xf32>
    %77 = tpu.matmul %75, %76, %cst_65 {dimension_numbers = #tpu.dot_dimension_numbers<[1], [0], [0], [1], [0, 0, 1, 1], [], []>} : vector<8x8xf32>, vector<8x2xf32>, vector<8x2xf32> -> vector<8x2xf32>
    %78 = vector.extract_strided_slice %74 {offsets = [8, 0], sizes = [8, 8], strides = [1, 1]} : vector<24x8xf32> to vector<8x8xf32>
    %c0_66 = arith.constant 0 : index
    %c0_67 = arith.constant 0 : index
    %79 = vector.load %arg24[%c0_66, %c0_67] : memref<8x2xf32, #tpu.memory_space<vmem>>, vector<8x2xf32>
    %cst_68 = arith.constant dense<0.000000e+00> : vector<8x2xf32>
    %80 = tpu.matmul %78, %79, %cst_68 {dimension_numbers = #tpu.dot_dimension_numbers<[1], [0], [0], [1], [0, 0, 1, 1], [], []>} : vector<8x8xf32>, vector<8x2xf32>, vector<8x2xf32> -> vector<8x2xf32>
    %81 = arith.addf %77, %80 : vector<8x2xf32>
    %82 = vector.extract_strided_slice %74 {offsets = [16, 0], sizes = [8, 8], strides = [1, 1]} : vector<24x8xf32> to vector<8x8xf32>
    %c0_69 = arith.constant 0 : index
    %c0_70 = arith.constant 0 : index
    %83 = vector.load %arg25[%c0_69, %c0_70] : memref<8x2xf32, #tpu.memory_space<vmem>>, vector<8x2xf32>
    %cst_71 = arith.constant dense<0.000000e+00> : vector<8x2xf32>
    %84 = tpu.matmul %82, %83, %cst_71 {dimension_numbers = #tpu.dot_dimension_numbers<[1], [0], [0], [1], [0, 0, 1, 1], [], []>} : vector<8x8xf32>, vector<8x2xf32>, vector<8x2xf32> -> vector<8x2xf32>
    %85 = arith.addf %81, %84 : vector<8x2xf32>
    %c0_72 = arith.constant 0 : index
    %c0_73 = arith.constant 0 : index
    %86 = vector.load %arg22[%c0_72, %c0_73] : memref<8x1xf32, #tpu.memory_space<vmem>>, vector<8x1xf32>
    %87 = vector.broadcast %86 : vector<8x1xf32> to vector<8x2xf32>
    %88 = arith.addf %85, %87 : vector<8x2xf32>
    %c0_74 = arith.constant 0 : index
    %c0_75 = arith.constant 0 : index
    %89 = vector.load %arg26[%c0_74, %c0_75] : memref<8x2xf32, #tpu.memory_space<vmem>>, vector<8x2xf32>
    tpu.vector_store %arg26[%c0_74, %c0_75], %88 {strides = array<i32>} : memref<8x2xf32, #tpu.memory_space<vmem>>, vector<8x2xf32>,
    return
  }
}

</mosaic_0001>

<bundles_post_ra>
// kernel: tpu_custom_call.1
= control target key start
LH: loop header
LB: loop body
LE: loop exit
PB: predicated region body
PF: predicated region fallthrough
CT: control target
= control target key end

     0   :  { %vm97_vm0 = vcmask 1043456   ;;  %vm87_vm1 = vcmask 31744   ;;  %v2539_v0 = vmov 0.0   ;;  %vm2540_vm2 = vmmov 0   ;;  %s3164_s0 = inlined_call_operand.vmem [shape: f32[4,128], index: 0, kind: input, shape index: {}]   ;;  %s3165_s1 = inlined_call_operand.vmem [shape: f32[24,4], index: 1, kind: input, shape index: {}]   ;;  %s3166_s3 = inlined_call_operand.vmem [shape: f32[128,64], index: 3, kind: input, shape index: {}]   ;;  %s3167_s4 = inlined_call_operand.vmem [shape: f32[128,64], index: 4, kind: input, shape index: {}]   ;;  %s3168_s2 = inlined_call_operand.vmem [shape: f32[8,1], index: 2, kind: input, shape index: {}]   ;;  %s3169_s7 = inlined_call_operand.vmem [shape: f32[8,1], index: 7, kind: input, shape index: {}]   ;;  %s3170_s17 = inlined_call_operand.vmem [shape: f32[16,1], index: 17, kind: input, shape index: {}]   ;;  %s3171_s22 = inlined_call_operand.vmem [shape: f32[8,1], index: 22, kind: input, shape index: {}]   ;;  %s3172_s5 = inlined_call_operand.vmem [shape: f32[128,64], index: 5, kind: input, shape index: {}]   ;;  %s3173_s9 = inlined_call_operand.vmem [shape: f32[64,32], index: 9, kind: input, shape index: {}]   ;;  %s3174_s6 = inlined_call_operand.vmem [shape: f32[24,8], index: 6, kind: input, shape index: {}]   ;;  %s3175_s10 = inlined_call_operand.vmem [shape: f32[64,32], index: 10, kind: input, shape index: {}]   ;;  %s3176_s8 = inlined_call_operand.vmem [shape: f32[64,32], index: 8, kind: input, shape index: {}]   ;;  %s3177_s11 = inlined_call_operand.vmem [shape: f32[48,8], index: 11, kind: input, shape index: {}]   ;;  %s3178_s14 = inlined_call_operand.vmem [shape: f32[32,16], index: 14, kind: input, shape index: {}]   ;;  %s3179_s13 = inlined_call_operand.vmem [shape: f32[32,16], index: 13, kind: input, shape index: {}]   ;;  %s3180_s12 = inlined_call_operand.vmem [shape: f32[16,1], index: 12, kind: input, shape index: {}]   ;;  %s3181_s15 = inlined_call_operand.vmem [shape: f32[32,16], index: 15, kind: input, shape index: {}]   ;;  %s3182_s16 = inlined_call_operand.vmem [shape: f32[48,16], index: 16, kind: input, shape index: {}]   ;;  %s3183_s19 = inlined_call_operand.vmem [shape: f32[16,8], index: 19, kind: input, shape index: {}]   ;;  %s3184_s18 = inlined_call_operand.vmem [shape: f32[16,8], index: 18, kind: input, shape index: {}]   ;;  %s3185_s20 = inlined_call_operand.vmem [shape: f32[16,8], index: 20, kind: input, shape index: {}]   ;;  %s3186_s21 = inlined_call_operand.vmem [shape: f32[24,16], index: 21, kind: input, shape index: {}]   ;;  %s3187_s24 = inlined_call_operand.vmem [shape: f32[8,2], index: 24, kind: input, shape index: {}]   ;;  %s3188_s23 = inlined_call_operand.vmem [shape: f32[8,2], index: 23, kind: input, shape index: {}]   ;;  %s3189_s25 = inlined_call_operand.vmem [shape: f32[8,2], index: 25, kind: input, shape index: {}]   ;;  %s3190_s26 = inlined_call_operand.vmem [shape: f32[8,2], index: 26, kind: output, shape index: {}]  }
   0x1   :  { %3198 = sst [smem:[#allocation2_spill]] %s3164_s0  ;;  %2084 = vmatprep.subr.mxu0 %v2539_v0  ;;  %2086 = vmatprep.mubr.msk.f32.mxu0 %vm2540_vm2, %v2539_v0  ;;  %v2541_v6 = vmov 0.0|0.0   ;;  %v2542_v54 = vmov 0   ;;  %vm451_vm3 = vcmask 64512   ;;  %vm557_vm4 = vcmask 523264  }
   0x2   :  { %3199 = sst [smem:[#allocation3_spill]] %s3165_s1  ;;  %2374 = vmatprep.subr.bf16.mxu1 %v2541_v6  ;;  %2127 = vmatprep.mubr.msk.f32.mxu1 %vm2540_vm2, %v2539_v0  ;;  %vm921_vm5 = vcmask 261120   ;;  %vm1193_vm6 = vcmask 130048   ;;  %vm1896_vm7 = vcmask 15360  }
   0x3   :  { %3200 = sst [smem:[#allocation4_spill]] %s3166_s3  ;;  %2537 = vset.pattern.permute.xlu0 %v2542_v54  ;;  %2538 = vset.pattern.permute.xlu1 %v2542_v54  ;;  %v705_v54 = vld [vmem:[%s3175_s10 + $0x8] sm:$0xff] }
   0x4   :  { %3201 = sst [smem:[#allocation5_spill]] %s3167_s4  ;;  %s3211_s3 = sld [smem:[#allocation4_spill]] }
   0x5   :  { %3202 = sst [smem:[#allocation6_spill]] %s3168_s2  ;;  %s3210_s2 = sld [smem:[#allocation3_spill]] }
   0x6   :  { %3203 = sst [smem:[#allocation7_spill]] %s3169_s7  ;;  %s3212_s27 = sld [smem:[#allocation5_spill]] }
   0x7   :  { %3204 = sst [smem:[#allocation8_spill]] %s3170_s17  ;;  %s3213_s17 = sld [smem:[#allocation6_spill]] }
   0x8   :  { %3205 = sst [smem:[#allocation9_spill]] %s3171_s22  ;;  %s3209_s22 = sld [smem:[#allocation2_spill]] }
   0x9   :  { %3206 = sst [smem:[#allocation10_spill]] %s3172_s5  ;;  %s3216_s0 = sld [smem:[#allocation9_spill]] }
   0xa   :  { %3207 = sst [smem:[#allocation11_spill]] %s3173_s9  ;;  %v181_v4 = vld [vmem:[%s3211_s3] sm:$0xff]  ;;  %v182_v5 = vld [vmem:[%s3211_s3 + $0x8] sm:$0xff]  ;;  %v183_v10 = vld [vmem:[%s3211_s3 + $0x10] sm:$0xff]  ;;  %s3217_s7 = sld [smem:[#allocation10_spill]] }
   0xb   :  { %3208 = sst [smem:[#allocation12_spill]] %s3174_s6  ;;  %v84_v2 = vld [vmem:[%s3210_s2] sm:$0xff]  ;;  %v85_v3 = vld [vmem:[%s3210_s2 + $0x8] sm:$0xff]  ;;  %v2399_v7 = vpack.c.bf16 %v182_v5, %v181_v4  ;;  %v184_v12 = vld [vmem:[%s3211_s3 + $0x18] sm:$0xff] }
   0xc   :  { %v197_v8 = vld [vmem:[%s3212_s27] sm:$0xff]  ;;  %v198_v9 = vld [vmem:[%s3212_s27 + $0x8] sm:$0xff]  ;;  %v199_v13 = vld [vmem:[%s3212_s27 + $0x10] sm:$0xff]  ;;  %v2402_v15 = vpack.c.bf16 %v184_v12, %v183_v10 }
   0xd   :  { %v2375_v11 = vpack.c.bf16 %v198_v9, %v197_v8  ;;  %v200_v14 = vld [vmem:[%s3212_s27 + $0x18] sm:$0xff]  ;;  %v185_v17 = vld [vmem:[%s3211_s3 + $0x20] sm:$0xff]  ;;  %v186_v18 = vld [vmem:[%s3211_s3 + $0x28] sm:$0xff] }
   0xe   :  { %v83_v1 = vld [vmem:[%s3209_s22] sm:$0xf]  ;;  %v2378_v16 = vpack.c.bf16 %v200_v14, %v199_v13  ;;  %v202_v20 = vld [vmem:[%s3212_s27 + $0x28] sm:$0xff]  ;;  %v86_v21 = vld [vmem:[%s3210_s2 + $0x10] sm:$0xff]  ;;  %v2405_v22 = vpack.c.bf16 %v186_v18, %v185_v17  ;;  %s3214_s2 = sld [smem:[#allocation7_spill]] }
   0xf   :  { %2085 = vmatpush3.msk.msra.mxu0 %vm97_vm0, %v83_v1  ;;  %2376 = vmatpush3.bf16.msra.mxu1 %v2375_v11  ;;  %v201_v19 = vld [vmem:[%s3212_s27 + $0x20] sm:$0xff]  ;;  %v187_v24 = vld [vmem:[%s3211_s3 + $0x30] sm:$0xff]  ;;  %v188_v25 = vld [vmem:[%s3211_s3 + $0x38] sm:$0xff] }
  0x10   :  { %2087 = vmatmul.mubr.msk.f32.vlgmr.msra.gmra.mrb[0].mxu0 %vm87_vm1, %v84_v2  ;;  %2398 = vmatprep.subr.bf16.mxu0 %v2541_v6  ;;  %v2381_v23 = vpack.c.bf16 %v202_v20, %v201_v19  ;;  %v203_v26 = vld [vmem:[%s3212_s27 + $0x30] sm:$0xff]  ;;  %v204_v27 = vld [vmem:[%s3212_s27 + $0x38] sm:$0xff]  ;;  %v2408_v28 = vpack.c.bf16 %v188_v25, %v187_v24  ;;  %v189_v30 = vld [vmem:[%s3211_s3 + $0x40] sm:$0xff] }
  0x11   :  { %2089 = vmatprep.mubr.msk.f32.mxu0 %vm2540_vm2, %v2539_v0  ;;  %2400 = vmatpush3.bf16.msra.mxu0 %v2399_v7  ;;  %v2384_v29 = vpack.c.bf16 %v204_v27, %v203_v26  ;;  %v190_v31 = vld [vmem:[%s3211_s3 + $0x48] sm:$0xff]  ;;  %v205_v32 = vld [vmem:[%s3212_s27 + $0x40] sm:$0xff]  ;;  %v191_v36 = vld [vmem:[%s3211_s3 + $0x50] sm:$0xff] }
  0x12   :  { %2401 = vmatprep.subr.bf16.mxu0 %v2541_v6  ;;  %2377 = vmatprep.subr.bf16.mxu1 %v2541_v6  ;;  %v206_v33 = vld [vmem:[%s3212_s27 + $0x48] sm:$0xff]  ;;  %v2411_v34 = vpack.c.bf16 %v190_v31, %v189_v30  ;;  %v192_v37 = vld [vmem:[%s3211_s3 + $0x58] sm:$0xff]  ;;  %v207_v38 = vld [vmem:[%s3212_s27 + $0x50] sm:$0xff] }
  0x13   :  { %2379 = vmatpush3.bf16.msra.mxu1 %v2378_v16  ;;  %v2387_v35 = vpack.c.bf16 %v206_v33, %v205_v32  ;;  %v208_v39 = vld [vmem:[%s3212_s27 + $0x58] sm:$0xff]  ;;  %v2414_v40 = vpack.c.bf16 %v192_v37, %v191_v36  ;;  %v193_v42 = vld [vmem:[%s3211_s3 + $0x60] sm:$0xff]  ;;  %v194_v43 = vld [vmem:[%s3211_s3 + $0x68] sm:$0xff] }
  0x14   :  { %2090 = vmatmul.mubr.msk.f32.gmra.mrb[2].mxu0 %vm87_vm1, %v85_v3  ;;  %2380 = vmatprep.subr.bf16.mxu1 %v2541_v6  ;;  %v2390_v41 = vpack.c.bf16 %v208_v39, %v207_v38  ;;  %v209_v44 = vld [vmem:[%s3212_s27 + $0x60] sm:$0xff]  ;;  %v210_v45 = vld [vmem:[%s3212_s27 + $0x68] sm:$0xff]  ;;  %v2417_v46 = vpack.c.bf16 %v194_v43, %v193_v42  ;;  %v195_v48 = vld [vmem:[%s3211_s3 + $0x70] sm:$0xff] }
  0x15   :  { %2092 = vmatprep.mubr.msk.f32.mxu0 %vm2540_vm2, %v2539_v0  ;;  %2403 = vmatpush3.bf16.msra.mxu0 %v2402_v15  ;;  %v2393_v47 = vpack.c.bf16 %v210_v45, %v209_v44  ;;  %v196_v49 = vld [vmem:[%s3211_s3 + $0x78] sm:$0xff]  ;;  %v211_v51 = vld [vmem:[%s3212_s27 + $0x70] sm:$0xff]  ;;  %v440_v55 = vld [vmem:[%s3213_s17] sm:$0xff] }
  0x16   :  { %2404 = vmatprep.subr.bf16.mxu0 %v2541_v6  ;;  %v2420_v50 = vpack.c.bf16 %v196_v49, %v195_v48  ;;  %v212_v52 = vld [vmem:[%s3212_s27 + $0x78] sm:$0xff]  ;;  %443 = vperm.xlu0 %2537, %v440_v55   ;;  %v786_v56 = vld [vmem:[%s3214_s2] sm:$0xff]  ;;  %s3215_s27 = sld [smem:[#allocation8_spill]]  ;;  %v354_v60 = vld [vmem:[%s3217_s7 + $0x8] sm:$0xff]  ;;  %s3218_s2 = sld [smem:[#allocation11_spill]] }
  0x17   :  { %2382 = vmatpush3.bf16.msra.mxu1 %v2381_v23  ;;  %v2396_v53 = vpack.c.bf16 %v212_v52, %v211_v51  ;;  %v1889_v58 = vld [vmem:[%s3216_s0] sm:$0xff]  ;;  %v355_v1 = vld [vmem:[%s3217_s7 + $0x10] sm:$0xff]  ;;  %v356_v2 = vld [vmem:[%s3217_s7 + $0x18] sm:$0xff]  ;;  %s3219_s0 = sld [smem:[#allocation12_spill]] }
  0x18   :  { %2093 = vmatmul.mubr.msk.f32.gmra.mrb[4].mxu0 %vm87_vm1, %v86_v21  ;;  %2383 = vmatprep.subr.bf16.mxu1 %v2541_v6  ;;  %v353_v59 = vld [vmem:[%s3217_s7] sm:$0xff]  ;;  %v2426_v5 = vpack.c.bf16 %v356_v2, %v355_v1  ;;  %v358_v8 = vld [vmem:[%s3217_s7 + $0x28] sm:$0xff]  ;;  %v359_v12 = vld [vmem:[%s3217_s7 + $0x30] sm:$0xff] }
  0x19   :  { %2162 = vmatprep.mubr.msk.f32.mxu0 %vm2540_vm2, %v2539_v0  ;;  %2406 = vmatpush3.bf16.msra.mxu0 %v2405_v22  ;;  %v2423_v63 = vpack.c.bf16 %v354_v60, %v353_v59  ;;  %v357_v7 = vld [vmem:[%s3217_s7 + $0x20] sm:$0xff]  ;;  %v360_v13 = vld [vmem:[%s3217_s7 + $0x38] sm:$0xff]  ;;  %v362_v16 = vld [vmem:[%s3217_s7 + $0x48] sm:$0xff] }
  0x1a   :  { %2407 = vmatprep.subr.bf16.mxu0 %v2541_v6  ;;  %789 = vperm.xlu0 %2537, %v786_v56   ;;  %v2429_v11 = vpack.c.bf16 %v358_v8, %v357_v7  ;;  %v2432_v14 = vpack.c.bf16 %v360_v13, %v359_v12  ;;  %v361_v15 = vld [vmem:[%s3217_s7 + $0x40] sm:$0xff]  ;;  %v363_v18 = vld [vmem:[%s3217_s7 + $0x50] sm:$0xff]  ;;  %v364_v19 = vld [vmem:[%s3217_s7 + $0x58] sm:$0xff] }
  0x1b   :  { %2385 = vmatpush3.bf16.msra.mxu1 %v2384_v29  ;;  %v2435_v17 = vpack.c.bf16 %v362_v16, %v361_v15  ;;  %v2438_v20 = vpack.c.bf16 %v364_v19, %v363_v18  ;;  %v365_v21 = vld [vmem:[%s3217_s7 + $0x60] sm:$0xff]  ;;  %v366_v22 = vld [vmem:[%s3217_s7 + $0x68] sm:$0xff]  ;;  %v367_v24 = vld [vmem:[%s3217_s7 + $0x70] sm:$0xff] }
  0x1c   :  { %2386 = vmatprep.subr.bf16.mxu1 %v2541_v6  ;;  %v1558_v57 = vld [vmem:[%s3215_s27] sm:$0xff]  ;;  %v2441_v23 = vpack.c.bf16 %v366_v22, %v365_v21  ;;  %v368_v25 = vld [vmem:[%s3217_s7 + $0x78] sm:$0xff]  ;;  %v550_v37 = vld [vmem:[%s3218_s2 + $0x8] sm:$0xff] }
  0x1d   :  { %2409 = vmatpush3.bf16.msra.mxu0 %v2408_v28  ;;  %v2444_v26 = vpack.c.bf16 %v368_v25, %v367_v24  ;;  %v549_v36 = vld [vmem:[%s3218_s2] sm:$0xff]  ;;  %v551_v42 = vld [vmem:[%s3218_s2 + $0x10] sm:$0xff]  ;;  %v552_v43 = vld [vmem:[%s3218_s2 + $0x18] sm:$0xff] }
  0x1e   :  { %2410 = vmatprep.subr.bf16.mxu0 %v2541_v6  ;;  %1562 = vperm.xlu0 %2537, %v1558_v57   ;;  %v449_v44 = vld [vmem:[%s3219_s0 + $0x8] sm:$0xff]  ;;  %v2450_v45 = vpack.c.bf16 %v552_v43, %v551_v42  ;;  %v450_v48 = vld [vmem:[%s3219_s0 + $0x10] sm:$0xff]  ;;  %v556_v51 = vld [vmem:[%s3218_s2 + $0x38] sm:$0xff] }
  0x1f   :  { %2388 = vmatpush3.bf16.msra.mxu1 %v2387_v35  ;;  %v706_v56 = vld [vmem:[%s3175_s10 + $0x10] sm:$0xff]  ;;  %v707_v57 = vld [vmem:[%s3175_s10 + $0x18] sm:$0xff]  ;;  %v708_v59 = vld [vmem:[%s3175_s10 + $0x20] sm:$0xff] }
  0x20   :  { %2389 = vmatprep.subr.bf16.mxu1 %v2541_v6  ;;  %v709_v60 = vld [vmem:[%s3175_s10 + $0x28] sm:$0xff]  ;;  %v541_v2 = vld [vmem:[%s3176_s8] sm:$0xff]  ;;  %v543_v8 = vld [vmem:[%s3176_s8 + $0x10] sm:$0xff] }
  0x21   :  { %2412 = vmatpush3.bf16.msra.mxu0 %v2411_v34  ;;  %v545_v13 = vld [vmem:[%s3176_s8 + $0x20] sm:$0xff]  ;;  %v547_v18 = vld [vmem:[%s3176_s8 + $0x30] sm:$0xff]  ;;  %v548_v19 = vld [vmem:[%s3176_s8 + $0x38] sm:$0xff] }
  0x22   :  { %2413 = vmatprep.subr.bf16.mxu0 %v2541_v6  ;;  %1892 = vperm.xlu0 %2537, %v1889_v58   ;;  %v2474_v58 = vpack.c.bf16 %v707_v57, %v706_v56  ;;  %v794_v21 = vld [vmem:[%s3177_s11] sm:$0xff]  ;;  %v920_v42 = vld [vmem:[%s3178_s14 + $0x18] sm:$0xff] }
  0x23   :  { %2391 = vmatpush3.bf16.msra.mxu1 %v2390_v41  ;;  %v2447_v41 = vpack.c.bf16 %v550_v37, %v549_v36  ;;  %v795_v36 = vld [vmem:[%s3177_s11 + $0x8] sm:$0xff]  ;;  %v796_v37 = vld [vmem:[%s3177_s11 + $0x10] sm:$0xff]  ;;  %v1084_v57 = vld [vmem:[%s3181_s15] sm:$0xff] }
  0x24   :  { %2392 = vmatprep.subr.bf16.mxu1 %v2541_v6 }
  0x25   :  { %2415 = vmatpush3.bf16.msra.mxu0 %v2414_v40  ;;  %v448_v40 = vld [vmem:[%s3219_s0] sm:$0xff] }
  0x26   :  { %2416 = vmatprep.subr.bf16.mxu0 %v2541_v6 }
  0x27   :  { %2394 = vmatpush3.bf16.msra.mxu1 %v2393_v47  ;;  %v554_v47 = vld [vmem:[%s3218_s2 + $0x28] sm:$0xff] }
  0x28   :  { %2395 = vmatprep.subr.bf16.mxu1 %v2541_v6 }
  0x29   :  { %2418 = vmatpush3.bf16.msra.mxu0 %v2417_v46  ;;  %v553_v46 = vld [vmem:[%s3218_s2 + $0x20] sm:$0xff] }
  0x2a   :  { %2419 = vmatprep.subr.bf16.mxu0 %v2541_v6  ;;  %v2453_v49 = vpack.c.bf16 %v554_v47, %v553_v46  ;;  %v1171_v47 = vld [vmem:[%s3180_s12] sm:$0xff] }
  0x2b   :  { %2397 = vmatpush3.bf16.msra.mxu1 %v2396_v53  ;;  %v704_v53 = vld [vmem:[%s3175_s10] sm:$0xff]  ;;  %1175 = vperm.xlu1 %2538, %v1171_v47  }
  0x2c   :  { %2422 = vmatprep.subr.bf16.mxu1 %v2541_v6  ;;  %v2471_v55 = vpack.c.bf16 %v705_v54, %v704_v53  ;;  %v916_v53 = vld [vmem:[%s3179_s13 + $0x18] sm:$0xff]  ;;  %v1666_v47 = vld [vmem:[%s3188_s23] sm:$0xff] }
  0x2d   :  { %2421 = vmatpush3.bf16.msra.mxu0 %v2420_v50  ;;  %v555_v50 = vld [vmem:[%s3218_s2 + $0x30] sm:$0xff] }
  0x2e   :  { %2200 = vmatprep.subr.mxu0 %v2539_v0  ;;  %v2456_v52 = vpack.c.bf16 %v556_v51, %v555_v50 }
  0x95   :  { %v444_v35 = vpop.permute.xlu0 %443 }
  0xe3   :  { %v167_v61 = vpop.f32.mrb[0].mxu0 }
  0xe4   :  { %v2088_v62 = vpop.f32.mrb[1].mxu0  ;;  %2163 = vmatmul.mubr.f32.vlgmr.msra.gmra.mrb[6].mxu0 %v167_v61  ;;  %v2477_v61 = vpack.c.bf16 %v709_v60, %v708_v59 }
  0xe5   :  { %2202 = vmatprep.mubr.msk.f32.mxu0 %vm2540_vm2, %v2539_v0  ;;  %v710_v62 = vld [vmem:[%s3175_s10 + $0x30] sm:$0xff] }
  0xe7   :  { %v172_v3 = vpop.f32.mrb[2].mxu0 }
  0xe8   :  { %v2091_v4 = vpop.f32.mrb[3].mxu0  ;;  %2128 = vmatmul.mubr.f32.vlgmr.msra.gmra.mrb[0].mxu1 %v172_v3  ;;  %v542_v3 = vld [vmem:[%s3176_s8 + $0x8] sm:$0xff] }
  0xe9   :  { %2424 = vmatpush3.bf16.msra.mxu1 %v2423_v63  ;;  %2197 = vmatprep.mubr.msk.f32.mxu1 %vm2540_vm2, %v2539_v0  ;;  %v711_v63 = vld [vmem:[%s3175_s10 + $0x38] sm:$0xff]  ;;  %v2459_v7 = vpack.c.bf16 %v542_v3, %v541_v2  ;;  %v1187_v2 = vld [vmem:[%s3182_s16] sm:$0xff]  ;;  %v1176_v3 = vpop.permute.xlu1 %1175 }
  0xea   :  { %2425 = vmatprep.subr.bf16.mxu1 %v2541_v6  ;;  %v2480_v1 = vpack.c.bf16 %v711_v63, %v710_v62  ;;  %v1086_v62 = vld [vmem:[%s3181_s15 + $0x10] sm:$0xff]  ;;  %v1087_v63 = vld [vmem:[%s3181_s15 + $0x18] sm:$0xff] }
  0xeb   :  { %v177_v9 = vpop.f32.mrb[4].mxu0 }
  0xec   :  { %v2094_v10 = vpop.f32.mrb[5].mxu0 }
  0xed   :  { %2427 = vmatpush3.bf16.msra.mxu1 %v2426_v5 }
  0xee   :  { %2428 = vmatprep.subr.bf16.mxu1 %v2541_v6 }
  0xf1   :  { %2430 = vmatpush3.bf16.msra.mxu1 %v2429_v11 }
  0xf2   :  { %2431 = vmatprep.subr.bf16.mxu1 %v2541_v6 }
  0xf5   :  { %2433 = vmatpush3.bf16.msra.mxu1 %v2432_v14  ;;  %v546_v14 = vld [vmem:[%s3176_s8 + $0x28] sm:$0xff] }
  0xf6   :  { %2434 = vmatprep.subr.bf16.mxu1 %v2541_v6 }
  0xf9   :  { %2436 = vmatpush3.bf16.msra.mxu1 %v2435_v17  ;;  %v2465_v17 = vpack.c.bf16 %v546_v14, %v545_v13 }
  0xfa   :  { %2437 = vmatprep.subr.bf16.mxu1 %v2541_v6 }
  0xfd   :  { %2439 = vmatpush3.bf16.msra.mxu1 %v2438_v20  ;;  %v2468_v20 = vpack.c.bf16 %v548_v19, %v547_v18  ;;  %v1191_v18 = vld [vmem:[%s3182_s16 + $0x20] sm:$0xff]  ;;  %v1192_v19 = vld [vmem:[%s3182_s16 + $0x28] sm:$0xff] }
  0xfe   :  { %2440 = vmatprep.subr.bf16.mxu1 %v2541_v6 }
 0x101   :  { %2442 = vmatpush3.bf16.msra.mxu1 %v2441_v23 }
 0x102   :  { %2443 = vmatprep.subr.bf16.mxu1 %v2541_v6 }
 0x105   :  { %2445 = vmatpush3.bf16.msra.mxu1 %v2444_v26 }
 0x106   :  { %2470 = vmatprep.subr.bf16.mxu1 %v2541_v6 }
 0x108   :  { %2198 = vmatmul.mubr.f32.vlgmr.msra.gmra.mrb[2].mxu1 %v177_v9  ;;  %v544_v9 = vld [vmem:[%s3176_s8 + $0x18] sm:$0xff] }
 0x109   :  { %2265 = vmatprep.mubr.msk.f32.mxu1 %vm2540_vm2, %v2539_v0  ;;  %2472 = vmatpush3.bf16.msra.mxu1 %v2471_v55  ;;  %v2462_v12 = vpack.c.bf16 %v544_v9, %v543_v8 }
 0x10a   :  { %2473 = vmatprep.subr.bf16.mxu1 %v2541_v6 }
 0x10d   :  { %2475 = vmatpush3.bf16.msra.mxu1 %v2474_v58  ;;  %v1085_v58 = vld [vmem:[%s3181_s15 + $0x8] sm:$0xff] }
 0x10e   :  { %2476 = vmatprep.subr.bf16.mxu1 %v2541_v6  ;;  %v2498_v60 = vpack.c.bf16 %v1085_v58, %v1084_v57 }
 0x111   :  { %2478 = vmatpush3.bf16.msra.mxu1 %v2477_v61 }
 0x112   :  { %2479 = vmatprep.subr.bf16.mxu1 %v2541_v6 }
 0x115   :  { %2481 = vmatpush3.bf16.msra.mxu1 %v2480_v1  ;;  %v2502_v1 = vpack.c.bf16 %v1087_v63, %v1086_v62 }
 0x1b7   :  { %v349_v27 = vpop.f32.mrb[6].mxu0 }
 0x1b8   :  { %v2164_v28 = vpop.f32.mrb[7].mxu0 }
 0x1bb   :  { %v279_v29 = vpop.f32.mrb[0].mxu1 }
 0x1bc   :  { %v350_v30 = vadd.f32 %v349_v27, %v279_v29  ;;  %v2129_v31 = vpop.f32.mrb[1].mxu1 }
 0x1bd   :  { %v917_v31 = vld [vmem:[%s3178_s14] sm:$0xff] }
 0x1db   :  { %v435_v32 = vpop.f32.mrb[2].mxu1 }
 0x1dc   :  { %v439_v33 = vadd.f32 %v435_v32, %v350_v30  ;;  %v2199_v34 = vpop.f32.mrb[3].mxu1  ;;  %v790_v30 = vpop.permute.xlu0 %789  ;;  %v918_v32 = vld [vmem:[%s3178_s14 + $0x8] sm:$0xff] }
 0x1de   :  { %v446_v38 = vadd.f32 %v444_v35, %v439_v33  ;;  %v2482_v35 = vpack.c.bf16 %v918_v32, %v917_v31 }
 0x1e0   :  { %v447_v39 = vmax.f32 %v446_v38, 0.0  ;;  %v797_v38 = vld [vmem:[%s3177_s11 + $0x18] sm:$0xff] }
 0x1e2   :  { %2201 = vmatpush3.msra.mxu0 %v447_v39  ;;  %v798_v39 = vld [vmem:[%s3177_s11 + $0x20] sm:$0xff] }
 0x1e3   :  { %2203 = vmatmul.mubr.msk.f32.vlgmr.msra.gmra.mrb[8].mxu0 %vm451_vm3, %v448_v40  ;;  %2446 = vmatprep.subr.bf16.mxu0 %v2541_v6  ;;  %v799_v40 = vld [vmem:[%s3177_s11 + $0x28] sm:$0xff] }
 0x1e4   :  { %2205 = vmatprep.mubr.msk.f32.mxu0 %vm2540_vm2, %v2539_v0  ;;  %2448 = vmatpush3.bf16.msra.mxu0 %v2447_v41  ;;  %v919_v41 = vld [vmem:[%s3178_s14 + $0x10] sm:$0xff] }
 0x1e5   :  { %2449 = vmatprep.subr.bf16.mxu0 %v2541_v6  ;;  %v2486_v43 = vpack.c.bf16 %v920_v42, %v919_v41  ;;  %v1574_v41 = vld [vmem:[%s3186_s21] sm:$0xff]  ;;  %v1575_v42 = vld [vmem:[%s3186_s21 + $0x8] sm:$0xff] }
 0x1e7   :  { %2206 = vmatmul.mubr.msk.f32.gmra.mrb[10].mxu0 %vm451_vm3, %v449_v44  ;;  %v913_v44 = vld [vmem:[%s3179_s13] sm:$0xff] }
 0x1e8   :  { %2208 = vmatprep.mubr.msk.f32.mxu0 %vm2540_vm2, %v2539_v0  ;;  %2451 = vmatpush3.bf16.msra.mxu0 %v2450_v45  ;;  %v914_v45 = vld [vmem:[%s3179_s13 + $0x8] sm:$0xff] }
 0x1e9   :  { %2452 = vmatprep.subr.bf16.mxu0 %v2541_v6  ;;  %v2490_v46 = vpack.c.bf16 %v914_v45, %v913_v44  ;;  %v1667_v44 = vld [vmem:[%s3187_s24] sm:$0xff] }
 0x1eb   :  { %2209 = vmatmul.mubr.msk.f32.gmra.mrb[12].mxu0 %vm451_vm3, %v450_v48  ;;  %v1172_v48 = vld [vmem:[%s3180_s12 + $0x8] sm:$0xff] }
 0x1ec   :  { %2454 = vmatpush3.bf16.msra.mxu0 %v2453_v49  ;;  %2227 = vmatprep.mubr.msk.f32.mxu0 %vm2540_vm2, %v2539_v0  ;;  %v1559_v49 = vld [vmem:[%s3215_s27 + $0x8] sm:$0xff] }
 0x1ed   :  { %2455 = vmatprep.subr.bf16.mxu0 %v2541_v6  ;;  %1180 = vperm.xlu1 %2538, %v1172_v48  }
 0x1f0   :  { %2457 = vmatpush3.bf16.msra.mxu0 %v2456_v52  ;;  %v915_v52 = vld [vmem:[%s3179_s13 + $0x10] sm:$0xff] }
 0x1f1   :  { %2458 = vmatprep.subr.bf16.mxu0 %v2541_v6  ;;  %1567 = vperm.xlu1 %2538, %v1559_v49   ;;  %v2494_v56 = vpack.c.bf16 %v916_v53, %v915_v52 }
 0x2b6   :  { %v527_v4 = vpop.f32.mrb[8].mxu0 }
 0x2b7   :  { %v2204_v5 = vpop.f32.mrb[9].mxu0 }
 0x2ba   :  { %v532_v10 = vpop.f32.mrb[10].mxu0 }
 0x2bb   :  { %v2207_v11 = vpop.f32.mrb[11].mxu0  ;;  %2228 = vmatmul.mubr.msk.f32.vlgmr.msra.gmra.mrb[14].mxu0 %vm557_vm4, %v532_v10 }
 0x2bc   :  { %2460 = vmatpush3.bf16.msra.mxu0 %v2459_v7  ;;  %2246 = vmatprep.mubr.msk.f32.mxu0 %vm2540_vm2, %v2539_v0  ;;  %v1310_v11 = vld [vmem:[%s3183_s19 + $0x8] sm:$0xff] }
 0x2bd   :  { %2461 = vmatprep.subr.bf16.mxu0 %v2541_v6 }
 0x2be   :  { %v537_v15 = vpop.f32.mrb[12].mxu0 }
 0x2bf   :  { %v2210_v16 = vpop.f32.mrb[13].mxu0  ;;  %2266 = vmatmul.mubr.msk.f32.vlgmr.msra.gmra.mrb[4].mxu1 %vm557_vm4, %v537_v15  ;;  %v1188_v15 = vld [vmem:[%s3182_s16 + $0x8] sm:$0xff] }
 0x2c0   :  { %2463 = vmatpush3.bf16.msra.mxu0 %v2462_v12  ;;  %2316 = vmatprep.mubr.msk.f32.mxu1 %vm1193_vm6, %v1187_v2  ;;  %v1189_v16 = vld [vmem:[%s3182_s16 + $0x10] sm:$0xff] }
 0x2c1   :  { %2464 = vmatprep.subr.bf16.mxu0 %v2541_v6 }
 0x2c4   :  { %2466 = vmatpush3.bf16.msra.mxu0 %v2465_v17  ;;  %v1190_v17 = vld [vmem:[%s3182_s16 + $0x18] sm:$0xff] }
 0x2c5   :  { %2467 = vmatprep.subr.bf16.mxu0 %v2541_v6 }
 0x2c8   :  { %2469 = vmatpush3.bf16.msra.mxu0 %v2468_v20  ;;  %v1307_v20 = vld [vmem:[%s3184_s18] sm:$0xff] }
 0x2cb   :  { %2247 = vmatmul.mubr.msk.f32.vlgmr.msra.gmra.mrb[16].mxu0 %vm557_vm4, %v527_v4  ;;  %v1181_v4 = vpop.permute.xlu1 %1180 }
 0x2cc   :  { %2270 = vmatprep.mubr.msk.f32.mxu0 %vm451_vm3, %v794_v21  ;;  %v1308_v21 = vld [vmem:[%s3184_s18 + $0x8] sm:$0xff] }
 0x2cf   :  { %v1568_v32 = vpop.permute.xlu1 %1567 }
 0x38e   :  { %v627_v22 = vpop.f32.mrb[14].mxu0 }
 0x38f   :  { %v2229_v23 = vpop.f32.mrb[15].mxu0 }
 0x392   :  { %v781_v24 = vpop.f32.mrb[4].mxu1 }
 0x393   :  { %v2267_v25 = vpop.f32.mrb[5].mxu1 }
 0x394   :  { %v1473_v25 = vld [vmem:[%s3185_s20] sm:$0xff] }
 0x39e   :  { %v700_v26 = vpop.f32.mrb[16].mxu0 }
 0x39f   :  { %v701_v27 = vadd.f32 %v700_v26, %v627_v22  ;;  %v2248_v28 = vpop.f32.mrb[17].mxu0  ;;  %v2514_v22 = vpack.c.bf16 %v1308_v21, %v1307_v20  ;;  %v1474_v26 = vld [vmem:[%s3185_s20 + $0x8] sm:$0xff] }
 0x3a1   :  { %v785_v29 = vadd.f32 %v781_v24, %v701_v27 }
 0x3a3   :  { %v792_v33 = vadd.f32 %v790_v30, %v785_v29  ;;  %v2518_v29 = vpack.c.bf16 %v1474_v26, %v1473_v25 }
 0x3a5   :  { %v793_v34 = vmax.f32 %v792_v33, 0.0 }
 0x3a7   :  { %2268 = vmatprep.subr.mxu0 %v793_v34 }
 0x3a8   :  { %2269 = vmatpush3.msra.mxu0 %v793_v34  ;;  %v1563_v34 = vpop.permute.xlu0 %1562 }
 0x3a9   :  { %2271 = vmatmul.mubr.msk.f32.vlgmr.msra.gmra.mrb[18].mxu0 %vm451_vm3, %v795_v36  ;;  %2483 = vmatprep.subr.bf16.mxu0 %v2482_v35 }
 0x3aa   :  { %2273 = vmatprep.mubr.msk.f32.mxu0 %vm451_vm3, %v796_v37  ;;  %2485 = vmatpush3.bf16.msra.mxu0 %v2482_v35 }
 0x3ab   :  { %2487 = vmatprep.subr.bf16.mxu0 %v2486_v43 }
 0x3ad   :  { %2274 = vmatmul.mubr.msk.f32.gmra.mrb[20].mxu0 %vm451_vm3, %v797_v38 }
 0x3ae   :  { %2276 = vmatprep.mubr.msk.f32.mxu0 %vm451_vm3, %v798_v39  ;;  %2489 = vmatpush3.bf16.msra.mxu0 %v2486_v43  ;;  %v1576_v43 = vld [vmem:[%s3186_s21 + $0x10] sm:$0xff] }
 0x3af   :  { %2491 = vmatprep.subr.bf16.mxu0 %v2490_v46 }
 0x3b1   :  { %2277 = vmatmul.mubr.msk.f32.gmra.mrb[22].mxu0 %vm451_vm3, %v799_v40 }
 0x47c   :  { %v2272_v50 = vpop.f32.mrb[18].mxu0 }
 0x47d   :  { %v884_v51 = vpop.f32.mrb[19].mxu0 }
 0x480   :  { %v2275_v54 = vpop.f32.mrb[20].mxu0 }
 0x481   :  { %v894_v55 = vpop.f32.mrb[21].mxu0 }
 0x482   :  { %2287 = vmatprep.mubr.msk.f32.mxu0 %vm921_vm5, %v894_v55 }
 0x483   :  { %2288 = vmatmul.mubr.msk.f32.vlgmr.msra.gmra.mrb[24].mxu0 %vm921_vm5, %v2275_v54 }
 0x484   :  { %2493 = vmatpush3.bf16.msra.mxu0 %v2490_v46  ;;  %2298 = vmatprep.mubr.msk.f32.mxu0 %vm921_vm5, %v884_v51  ;;  %v2278_v59 = vpop.f32.mrb[22].mxu0 }
 0x485   :  { %2495 = vmatprep.subr.bf16.mxu0 %v2494_v56  ;;  %v904_v61 = vpop.f32.mrb[23].mxu0 }
 0x488   :  { %2497 = vmatpush3.bf16.msra.mxu0 %v2494_v56 }
 0x489   :  { %2499 = vmatprep.subr.bf16.mxu0 %v2498_v60 }
 0x48b   :  { %2299 = vmatmul.mubr.msk.f32.vlgmr.msra.gmra.mrb[24].mxu0 %vm921_vm5, %v2272_v50  ;;  %v1814_v50 = vld [vmem:[%s3189_s25] sm:$0xff] }
 0x48c   :  { %2501 = vmatpush3.bf16.msra.mxu0 %v2498_v60  ;;  %2309 = vmatprep.mubr.msk.f32.mxu0 %vm921_vm5, %v904_v61  ;;  %v1893_v61 = vpop.permute.xlu0 %1892 }
 0x48d   :  { %2503 = vmatprep.subr.bf16.mxu0 %v2502_v1 }
 0x490   :  { %2505 = vmatpush3.bf16.msra.mxu0 %v2502_v1 }
 0x491   :  { %2522 = vmatprep.subr.bf16.mxu0 %v2541_v6  ;;  %v1309_v6 = vld [vmem:[%s3183_s19] sm:$0xff] }
 0x492   :  { %v2510_v14 = vpack.c.bf16 %v1310_v11, %v1309_v6 }
 0x493   :  { %2310 = vmatmul.mubr.msk.f32.vlgmr.msra.gmra.mrb[24].mxu0 %vm921_vm5, %v2278_v59 }
 0x494   :  { %2350 = vmatprep.mubr.msk.f32.mxu0 %vm2540_vm2, %v2539_v0 }
 0x566   :  { %v2311_v5 = vpop.f32.mrb[24].mxu0 }
 0x567   :  { %v1184_v7 = vadd.f32 %v2311_v5, %v1181_v4  ;;  %v1160_v8 = vpop.f32.mrb[25].mxu0 }
 0x568   :  { %v1183_v9 = vadd.f32 %v1176_v3, %v1160_v8 }
 0x569   :  { %v1186_v10 = vmax.f32 %v1184_v7, 0.0 }
 0x56a   :  { %v1185_v12 = vmax.f32 %v1183_v9, 0.0 }
 0x56c   :  { %v2506_v13 = vpack.c.bf16 %v1186_v10, %v1185_v12 }
 0x56e   :  { %2507 = vmatprep.subr.bf16.mxu1 %v2506_v13 }
 0x56f   :  { %2509 = vmatpush3.bf16.msra.mxu1 %v2506_v13 }
 0x570   :  { %2511 = vmatprep.subr.bf16.mxu1 %v2510_v14 }
 0x572   :  { %2317 = vmatmul.mubr.msk.f32.vlgmr.msra.gmra.mrb[6].mxu1 %vm1193_vm6, %v1188_v15 }
 0x573   :  { %2319 = vmatprep.mubr.msk.f32.mxu1 %vm1193_vm6, %v1189_v16  ;;  %2513 = vmatpush3.bf16.msra.mxu1 %v2510_v14 }
 0x574   :  { %2515 = vmatprep.subr.bf16.mxu1 %v2514_v22 }
 0x576   :  { %2320 = vmatmul.mubr.msk.f32.gmra.mrb[8].mxu1 %vm1193_vm6, %v1190_v17 }
 0x577   :  { %2322 = vmatprep.mubr.msk.f32.mxu1 %vm1193_vm6, %v1191_v18 }
 0x57a   :  { %2323 = vmatmul.mubr.msk.f32.gmra.mrb[10].mxu1 %vm1193_vm6, %v1192_v19 }
 0x645   :  { %v2318_v23 = vpop.f32.mrb[6].mxu1 }
 0x646   :  { %v1278_v24 = vpop.f32.mrb[7].mxu1 }
 0x649   :  { %v2321_v27 = vpop.f32.mrb[8].mxu1 }
 0x64a   :  { %v1288_v28 = vpop.f32.mrb[9].mxu1 }
 0x64b   :  { %2329 = vmatprep.mubr.msk.f32.mxu1 %vm1193_vm6, %v1288_v28 }
 0x64c   :  { %2330 = vmatmul.mubr.msk.f32.vlgmr.msra.gmra.mrb[12].mxu1 %vm1193_vm6, %v2321_v27 }
 0x64d   :  { %2336 = vmatprep.mubr.msk.f32.mxu1 %vm1193_vm6, %v1278_v24  ;;  %2517 = vmatpush3.bf16.msra.mxu1 %v2514_v22  ;;  %v2324_v30 = vpop.f32.mrb[10].mxu1 }
 0x64e   :  { %2519 = vmatprep.subr.bf16.mxu1 %v2518_v29  ;;  %v1298_v31 = vpop.f32.mrb[11].mxu1 }
 0x654   :  { %2337 = vmatmul.mubr.msk.f32.vlgmr.msra.gmra.mrb[12].mxu1 %vm1193_vm6, %v2318_v23 }
 0x655   :  { %2521 = vmatpush3.bf16.msra.mxu1 %v2518_v29  ;;  %2343 = vmatprep.mubr.msk.f32.mxu1 %vm1193_vm6, %v1298_v31 }
 0x656   :  { %2359 = vmatprep.subr.mxu1 %v2539_v0 }
 0x65c   :  { %2344 = vmatmul.mubr.msk.f32.vlgmr.msra.gmra.mrb[12].mxu1 %vm1193_vm6, %v2324_v30 }
 0x65d   :  { %2361 = vmatprep.mubr.msk.f32.mxu1 %vm2540_vm2, %v2539_v0  ;;  %2360 = vmatpush3.msra.mxu1 %v1667_v44 }
 0x65e   :  { %2364 = vmatprep.subr.mxu1 %v2539_v0 }
 0x72f   :  { %v2345_v33 = vpop.f32.mrb[12].mxu1 }
 0x730   :  { %v1571_v35 = vadd.f32 %v2345_v33, %v1568_v32  ;;  %v1547_v36 = vpop.f32.mrb[13].mxu1 }
 0x731   :  { %v1570_v37 = vadd.f32 %v1563_v34, %v1547_v36 }
 0x732   :  { %v1573_v38 = vmax.f32 %v1571_v35, 0.0 }
 0x733   :  { %v1572_v39 = vmax.f32 %v1570_v37, 0.0 }
 0x735   :  { %v2523_v40 = vpack.c.bf16 %v1573_v38, %v1572_v39 }
 0x737   :  { %2524 = vmatpush3.bf16.msra.mxu0 %v2523_v40 }
 0x73a   :  { %2351 = vmatmul.mubr.msk.f32.vlgmr.msra.gmra.mrb[26].mxu0 %vm1193_vm6, %v1574_v41 }
 0x73b   :  { %2353 = vmatprep.mubr.msk.f32.mxu0 %vm2540_vm2, %v2539_v0 }
 0x73e   :  { %2354 = vmatmul.mubr.msk.f32.gmra.mrb[28].mxu0 %vm1193_vm6, %v1575_v42 }
 0x73f   :  { %2356 = vmatprep.mubr.msk.f32.mxu0 %vm2540_vm2, %v2539_v0 }
 0x742   :  { %2357 = vmatmul.mubr.msk.f32.gmra.mrb[30].mxu0 %vm1193_vm6, %v1576_v43 }
 0x80d   :  { %v1652_v45 = vpop.f32.mrb[26].mxu0 }
 0x80e   :  { %v2352_v46 = vpop.f32.mrb[27].mxu0 }
 0x811   :  { %v1657_v48 = vpop.f32.mrb[28].mxu0 }
 0x812   :  { %2362 = vmatmul.mubr.msk.f32.vlgmr.msra.gmra.mrb[14].mxu1 %vm451_vm3, %v1657_v48  ;;  %v2355_v49 = vpop.f32.mrb[29].mxu0 }
 0x813   :  { %2365 = vmatpush3.msra.mxu1 %v1666_v47  ;;  %2366 = vmatprep.mubr.msk.f32.mxu1 %vm2540_vm2, %v2539_v0 }
 0x814   :  { %2369 = vmatprep.subr.mxu1 %v2539_v0 }
 0x815   :  { %v1662_v51 = vpop.f32.mrb[30].mxu0 }
 0x816   :  { %2367 = vmatmul.mubr.msk.f32.vlgmr.msra.gmra.mrb[16].mxu1 %vm451_vm3, %v1652_v45  ;;  %v2358_v52 = vpop.f32.mrb[31].mxu0 }
 0x817   :  { %2370 = vmatpush3.msra.mxu1 %v1814_v50  ;;  %2371 = vmatprep.mubr.msk.f32.mxu1 %vm2540_vm2, %v2539_v0 }
 0x81a   :  { %2372 = vmatmul.mubr.msk.f32.vlgmr.msra.gmra.mrb[18].mxu1 %vm451_vm3, %v1662_v51 }
 0x8e5   :  { %v1737_v53 = vpop.f32.mrb[14].mxu1 }
 0x8e6   :  { %v2363_v54 = vpop.f32.mrb[15].mxu1 }
 0x8e9   :  { %v1810_v55 = vpop.f32.mrb[16].mxu1 }
 0x8ea   :  { %v1811_v56 = vadd.f32 %v1810_v55, %v1737_v53  ;;  %v2368_v57 = vpop.f32.mrb[17].mxu1 }
 0x8ed   :  { %v1884_v58 = vpop.f32.mrb[18].mxu1 }
 0x8ee   :  { %v1888_v59 = vadd.f32 %v1884_v58, %v1811_v56  ;;  %v2373_v60 = vpop.f32.mrb[19].mxu1 }
 0x8f0   :  { %v1895_v62 = vadd.f32 %v1893_v61, %v1888_v59 }
 0x8f2   :  { %1897 = vst.msk [vmem:[%s3190_s26] sm:$0xff] %vm1896_vm7, %v1895_v62 }

</bundles_post_ra>
